<compile_context>
chip_gen: v7x
topology: tpu7x:2x2x1
jax: 0.10.0
libtpu: 0.0.40
codegen_flags: <defaults>
</compile_context>

<pallas_src>
import jax
import jax.numpy as jnp
from jax.experimental import pallas as pl
from jax.experimental.pallas import tpu as pltpu

_LANE = 128
_VMEM_BUDGET = 48 * 1024 * 1024   # conservative: fits v7x's 64 MiB physical VMEM


def _round_up(x, m):
    return ((x + m - 1) // m) * m


def _vmem_estimate(tb, d, h):
    """Rough per-grid-step VMEM footprint (bytes)."""
    return (2 * tb * d * 4            # double-buffered f32 x tile
            + d * h * 2 + h * h * 2   # resident bf16 weights (single-buffered)
            + 3 * 8 * h * 4           # lane-dense [1,H] bias/w3 rows (8-sublane pad)
            + 2 * 8 * tb * 4          # double-buffered [1, tb] f32 output
            + 2 * tb * h * 4          # f32 h1 / h2 temporaries
            + tb * h * 2)             # bf16 h1 handoff


def _mlp_scorer_kernel(x_ref, w1_ref, b1_ref, w2_ref, b2_ref, w3_ref, b3_ref,
                       o_ref):
    # x tile in natural [tb, D] layout; cast to bf16 in-kernel (no wrapper pass).
    x = x_ref[...].astype(jnp.bfloat16)

    # Layer 1: relu(x @ W1^T + b1) -> [tb, H]; bias is lane-dense [1, H].
    h1 = jnp.dot(x, w1_ref[...], preferred_element_type=jnp.float32)
    # Fused ReLU + bf16 down-cast: layer-1 -> layer-2 handoff stays bf16.
    h1 = jnp.maximum(h1 + b1_ref[...], 0.0).astype(jnp.bfloat16)

    # Layer 2: relu(h1 @ W2^T + b2) -> [tb, H], f32 bias-add / ReLU on the VPU.
    h2 = jnp.dot(h1, w2_ref[...], preferred_element_type=jnp.float32)
    h2 = jnp.maximum(h2 + b2_ref[...], 0.0)

    # Layer 3 (output width 1): contract over H -> lane-dense [1, tb] row.
    s = jax.lax.dot_general(
        w3_ref[...], h2,
        dimension_numbers=(((1,), (1,)), ((), ())),
        preferred_element_type=jnp.float32)
    o_ref[...] = jnp.maximum(s + b3_ref[0], 0.0).astype(o_ref.dtype)


def mlp_scorer_forward(x, params, *, tile_b=1024):
    """x: [B, input_dim] float32.  params: PyTorch-layout w1,b1,w2,b2,w3,b3."""
    B, D = x.shape
    H = params["w1"].shape[0]

    # ---- batch tile: lane-aligned, clipped to the VMEM budget -------------
    tb = max(_LANE, min(_round_up(tile_b, _LANE), _round_up(B, _LANE)))
    while tb > _LANE and _vmem_estimate(tb, D, H) > _VMEM_BUDGET:
        tb = max(_LANE, (tb // 2) // _LANE * _LANE)
    b_padded = _round_up(B, tb)
    n_tiles = b_padded // tb

    # x keeps its natural [B, D] layout; only zero-pad the batch when needed.
    if b_padded != B:
        x = jnp.pad(x, ((0, b_padded - B), (0, 0)))

    # ---- one-time weight layout plumbing (weights only, never activations).
    w1t = params["w1"].T.astype(jnp.bfloat16)             # [D, H]
    w2t = params["w2"].T.astype(jnp.bfloat16)             # [H, H]
    b1 = params["b1"].reshape(1, H).astype(jnp.float32)   # lane-dense rows
    b2 = params["b2"].reshape(1, H).astype(jnp.float32)
    w3 = params["w3"].reshape(1, H).astype(jnp.float32)
    b3 = params["b3"].reshape(1).astype(jnp.float32)      # SMEM scalar

    # Resident operands: constant block index; fetched once, single-buffered.
    def resident(a):
        try:
            return pl.BlockSpec(a.shape, lambda i: (0, 0),
                                pipeline_mode=pl.Buffered(1))
        except Exception:  # older JAX without pipeline_mode/Buffered
            return pl.BlockSpec(a.shape, lambda i: (0, 0))

    flops = 2 * b_padded * (D * H + H * H + H)
    bytes_accessed = (b_padded * D * 4                     # x (f32, one pass)
                      + (w1t.size + w2t.size) * 2
                      + (b1.size + b2.size + w3.size + b3.size) * 4
                      + b_padded * 4)                      # scores

    vmem_limit = int(min(max(32 * 1024 * 1024, 2 * _vmem_estimate(tb, D, H)),
                         _VMEM_BUDGET))

    # TODO(synk): on v7x, consider pltpu.CORE_PARALLEL on the batch axis and
    # a per-hidden-dim VPU path for layer 2 when H <= 64; "parallel" + MXU is
    # kept here for portability across v5e/v6e/v7x.
    out = pl.pallas_call(
        _mlp_scorer_kernel,
        out_shape=jax.ShapeDtypeStruct((1, b_padded), jnp.float32),
        grid=(n_tiles,),
        in_specs=[
            pl.BlockSpec((tb, D), lambda i: (i, 0)),       # streamed x tiles
            resident(w1t), resident(b1),
            resident(w2t), resident(b2),
            resident(w3),
            pl.BlockSpec(memory_space=pltpu.MemorySpace.SMEM),   # b3 scalar
        ],
        out_specs=pl.BlockSpec((1, tb), lambda i: (0, i)),  # lane-dense scores
        compiler_params=pltpu.CompilerParams(
            dimension_semantics=("parallel",),
            vmem_limit_bytes=vmem_limit),
        cost_estimate=pl.CostEstimate(
            flops=flops, transcendentals=0, bytes_accessed=bytes_accessed),
    )(x, w1t, b1, w2t, b2, w3, b3)

    return out[0, :B].reshape(B, 1)


def init_mlp_scorer_params(key, input_dim, hidden_dim):
    """PyTorch nn.Linear layout: weight [out, in], bias [out]."""
    ks = jax.random.split(key, 6)

    def linear_init(kw, kb, fan_in, fan_out):
        bound = 1.0 / jnp.sqrt(jnp.float32(fan_in))
        w = jax.random.uniform(kw, (fan_out, fan_in), jnp.float32, -bound, bound)
        b = jax.random.uniform(kb, (fan_out,), jnp.float32, -bound, bound)
        return w, b

    w1, b1 = linear_init(ks[0], ks[1], input_dim, hidden_dim)
    w2, b2 = linear_init(ks[2], ks[3], hidden_dim, hidden_dim)
    w3, b3 = linear_init(ks[4], ks[5], hidden_dim, 1)
    return {"w1": w1, "b1": b1, "w2": w2, "b2": b2, "w3": w3, "b3": b3}


def mlp_scorer_reference(x, p):
    """Pure-JAX reference mirroring the kernel's bf16-operand / f32-accum math."""
    h1 = jnp.dot(x.astype(jnp.bfloat16), p["w1"].astype(jnp.bfloat16).T,
                 preferred_element_type=jnp.float32)
    h1 = jnp.maximum(h1 + p["b1"], 0.0).astype(jnp.bfloat16)
    h2 = jnp.dot(h1, p["w2"].astype(jnp.bfloat16).T,
                 preferred_element_type=jnp.float32)
    h2 = jnp.maximum(h2 + p["b2"], 0.0)
    h3 = jnp.dot(h2, p["w3"].T.astype(jnp.float32)) + p["b3"]
    return jnp.maximum(h3, 0.0)


if __name__ == "__main__":
    key = jax.random.PRNGKey(0)
    k_params, k_x = jax.random.split(key)

    batch, input_dim, hidden_dim = 8, 32, 32
    params = init_mlp_scorer_params(k_params, input_dim, hidden_dim)
    x = jax.random.normal(k_x, (batch, input_dim), jnp.float32)

    out = jax.block_until_ready(mlp_scorer_forward(x, params))
    ref = mlp_scorer_reference(x, params)

    assert out.shape == (batch, 1), out.shape
    assert jnp.allclose(out, ref, atol=1e-2, rtol=1e-2), (out, ref)

    print("KERNEL_OK")
</pallas_src>

<mosaic_0001>
module attributes {stable_mosaic.version = 11 : i64} {
  func.func @_mlp_scorer_kernel(%arg0: i32, %arg1: memref<128x32xf32, #tpu.memory_space<vmem>>, %arg2: memref<32x32xbf16, #tpu.memory_space<vmem>>, %arg3: memref<1x32xf32, #tpu.memory_space<vmem>>, %arg4: memref<32x32xbf16, #tpu.memory_space<vmem>>, %arg5: memref<1x32xf32, #tpu.memory_space<vmem>>, %arg6: memref<1x32xf32, #tpu.memory_space<vmem>>, %arg7: memref<1xf32, #tpu.memory_space<smem>>, %arg8: memref<1x128xf32, #tpu.memory_space<vmem>>) attributes {dimension_semantics = [#tpu.dimension_semantics<parallel>], iteration_bounds = array<i64: 1>, scalar_prefetch = 0 : i64, scratch_operands = 0 : i64, tpu.core_type = #tpu.core_type<tc>, window_params = [{transform_indices = @transform_0, window_bounds = array<i64: 128, 32>}, {pipeline_mode = #tpu.pipeline_mode<synchronous>, transform_indices = @transform_1, window_bounds = array<i64: 32, 32>}, {pipeline_mode = #tpu.pipeline_mode<synchronous>, transform_indices = @transform_2, window_bounds = array<i64: 1, 32>}, {pipeline_mode = #tpu.pipeline_mode<synchronous>, transform_indices = @transform_3, window_bounds = array<i64: 32, 32>}, {pipeline_mode = #tpu.pipeline_mode<synchronous>, transform_indices = @transform_4, window_bounds = array<i64: 1, 32>}, {pipeline_mode = #tpu.pipeline_mode<synchronous>, transform_indices = @transform_5, window_bounds = array<i64: 1, 32>}, {transform_indices = @transform_6, window_bounds = array<i64: 1>}, {transform_indices = @transform_7, window_bounds = array<i64: 1, 128>}]} {
    %c0 = arith.constant 0 : index
    %c0_0 = arith.constant 0 : index
    %0 = vector.load %arg1[%c0, %c0_0] : memref<128x32xf32, #tpu.memory_space<vmem>>, vector<128x32xf32>
    %1 = arith.truncf %0 : vector<128x32xf32> to vector<128x32xbf16>
    %c0_1 = arith.constant 0 : index
    %c0_2 = arith.constant 0 : index
    %2 = vector.load %arg2[%c0_1, %c0_2] : memref<32x32xbf16, #tpu.memory_space<vmem>>, vector<32x32xbf16>
    %cst = arith.constant dense<0.000000e+00> : vector<128x32xf32>
    %3 = tpu.matmul %1, %2, %cst {dimension_numbers = #tpu.dot_dimension_numbers<[1], [0], [0], [1], [0, 0, 1, 1], [], []>} : vector<128x32xbf16>, vector<32x32xbf16>, vector<128x32xf32> -> vector<128x32xf32>
    %c0_3 = arith.constant 0 : index
    %c0_4 = arith.constant 0 : index
    %4 = vector.load %arg3[%c0_3, %c0_4] : memref<1x32xf32, #tpu.memory_space<vmem>>, vector<1x32xf32>
    %5 = vector.broadcast %4 : vector<1x32xf32> to vector<128x32xf32>
    %6 = arith.addf %3, %5 : vector<128x32xf32>
    %cst_5 = arith.constant 0.000000e+00 : f32
    %7 = vector.broadcast %cst_5 : f32 to vector<128x32xf32>
    %8 = arith.maximumf %6, %7 : vector<128x32xf32>
    %9 = arith.truncf %8 : vector<128x32xf32> to vector<128x32xbf16>
    %c0_6 = arith.constant 0 : index
    %c0_7 = arith.constant 0 : index
    %10 = vector.load %arg4[%c0_6, %c0_7] : memref<32x32xbf16, #tpu.memory_space<vmem>>, vector<32x32xbf16>
    %cst_8 = arith.constant dense<0.000000e+00> : vector<128x32xf32>
    %11 = tpu.matmul %9, %10, %cst_8 {dimension_numbers = #tpu.dot_dimension_numbers<[1], [0], [0], [1], [0, 0, 1, 1], [], []>} : vector<128x32xbf16>, vector<32x32xbf16>, vector<128x32xf32> -> vector<128x32xf32>
    %c0_9 = arith.constant 0 : index
    %c0_10 = arith.constant 0 : index
    %12 = vector.load %arg5[%c0_9, %c0_10] : memref<1x32xf32, #tpu.memory_space<vmem>>, vector<1x32xf32>
    %13 = vector.broadcast %12 : vector<1x32xf32> to vector<128x32xf32>
    %14 = arith.addf %11, %13 : vector<128x32xf32>
    %cst_11 = arith.constant 0.000000e+00 : f32
    %15 = vector.broadcast %cst_11 : f32 to vector<128x32xf32>
    %16 = arith.maximumf %14, %15 : vector<128x32xf32>
    %c0_12 = arith.constant 0 : index
    %c0_13 = arith.constant 0 : index
    %17 = vector.load %arg6[%c0_12, %c0_13] : memref<1x32xf32, #tpu.memory_space<vmem>>, vector<1x32xf32>
    %cst_14 = arith.constant dense<0.000000e+00> : vector<1x128xf32>
    %18 = tpu.matmul %17, %16, %cst_14 {dimension_numbers = #tpu.dot_dimension_numbers<[1], [1], [0], [0], [0, 0, 1, 0], [], []>} : vector<1x32xf32>, vector<128x32xf32>, vector<1x128xf32> -> vector<1x128xf32>
    %c0_15 = arith.constant 0 : index
    %19 = memref.load %arg7[%c0_15] : memref<1xf32, #tpu.memory_space<smem>>
    %20 = vector.broadcast %19 : f32 to vector<1x128xf32>
    %21 = arith.addf %18, %20 : vector<1x128xf32>
    %cst_16 = arith.constant 0.000000e+00 : f32
    %22 = vector.broadcast %cst_16 : f32 to vector<1x128xf32>
    %23 = arith.maximumf %21, %22 : vector<1x128xf32>
    %c0_17 = arith.constant 0 : index
    %c0_18 = arith.constant 0 : index
    %24 = vector.load %arg8[%c0_17, %c0_18] : memref<1x128xf32, #tpu.memory_space<vmem>>, vector<1x128xf32>
    tpu.vector_store %arg8[%c0_17, %c0_18], %23 {strides = array<i32>} : memref<1x128xf32, #tpu.memory_space<vmem>>, vector<1x128xf32>,
    return
  }
  func.func @transform_0(%arg0: i32) -> (i32, i32) {
    %c0_i32 = arith.constant 0 : i32
    %c0_i32_0 = arith.constant 0 : i32
    return %arg0, %c0_i32 : i32, i32
  }
  func.func @transform_1(%arg0: i32) -> (i32, i32) {
    %c0_i32 = arith.constant 0 : i32
    %c0_i32_0 = arith.constant 0 : i32
    %c0_i32_1 = arith.constant 0 : i32
    return %c0_i32, %c0_i32_0 : i32, i32
  }
  func.func @transform_2(%arg0: i32) -> (i32, i32) {
    %c0_i32 = arith.constant 0 : i32
    %c0_i32_0 = arith.constant 0 : i32
    %c0_i32_1 = arith.constant 0 : i32
    return %c0_i32, %c0_i32_0 : i32, i32
  }
  func.func @transform_3(%arg0: i32) -> (i32, i32) {
    %c0_i32 = arith.constant 0 : i32
    %c0_i32_0 = arith.constant 0 : i32
    %c0_i32_1 = arith.constant 0 : i32
    return %c0_i32, %c0_i32_0 : i32, i32
  }
  func.func @transform_4(%arg0: i32) -> (i32, i32) {
    %c0_i32 = arith.constant 0 : i32
    %c0_i32_0 = arith.constant 0 : i32
    %c0_i32_1 = arith.constant 0 : i32
    return %c0_i32, %c0_i32_0 : i32, i32
  }
  func.func @transform_5(%arg0: i32) -> (i32, i32) {
    %c0_i32 = arith.constant 0 : i32
    %c0_i32_0 = arith.constant 0 : i32
    %c0_i32_1 = arith.constant 0 : i32
    return %c0_i32, %c0_i32_0 : i32, i32
  }
  func.func @transform_6(%arg0: i32) -> i32 {
    %c0_i32 = arith.constant 0 : i32
    %c0_i32_0 = arith.constant 0 : i32
    return %c0_i32 : i32
  }
  func.func @transform_7(%arg0: i32) -> (i32, i32) {
    %c0_i32 = arith.constant 0 : i32
    %c0_i32_0 = arith.constant 0 : i32
    return %c0_i32, %arg0 : i32, i32
  }
}

</mosaic_0001>

<bundles_post_ra>
// kernel: tpu_custom_call.1
= control target key start
LH: loop header
LB: loop body
LE: loop exit
PB: predicated region body
PF: predicated region fallthrough
CT: control target
= control target key end

     0   :  { %vm76_vm0 = vcmask 261120   ;;  %s912_s0 = inlined_call_operand.vmem [shape: f32[128,32], index: 0, kind: input, shape index: {}]   ;;  %s913_s1 = inlined_call_operand.vmem [shape: bf16[32,32], index: 1, kind: input, shape index: {}]   ;;  %s914_s2 = inlined_call_operand.vmem [shape: f32[1,32], index: 2, kind: input, shape index: {}]   ;;  %s915_s3 = inlined_call_operand.vmem [shape: bf16[32,32], index: 3, kind: input, shape index: {}]   ;;  %s916_s4 = inlined_call_operand.vmem [shape: f32[1,32], index: 4, kind: input, shape index: {}]   ;;  %s917_s5 = inlined_call_operand.vmem [shape: f32[1,32], index: 5, kind: input, shape index: {}]   ;;  %s918_s6 = inlined_call_operand.<no memory space> [shape: f32[1], index: 6, kind: input, shape index: {}]   ;;  %s919_s7 = inlined_call_operand.hbm [shape: f32[1,128], index: 7, kind: output, shape index: {}]  }
   0x1   :  { %v709_v0 = vld [vmem:[%s913_s1] sm:$0xff]   ;;  %v710_v1 = vld [vmem:[%s913_s1 + $0x8] sm:$0xff]   ;;  %v31_v5 = vld [vmem:[%s912_s0 + $0x10] sm:$0xff] }
   0x2   :  { %598 = vmatprep.subr.bf16.mxu1 %v709_v0  ;;  %v29_v2 = vld [vmem:[%s912_s0] sm:$0xff]  ;;  %v30_v3 = vld [vmem:[%s912_s0 + $0x8] sm:$0xff]  ;;  %v32_v6 = vld [vmem:[%s912_s0 + $0x18] sm:$0xff] }
   0x3   :  { %599 = vmatpush3.bf16.msra.mxu1 %v709_v0  ;;  %v45_v4 = vpack.c.bf16 %v30_v3, %v29_v2  ;;  %v33_v7 = vld [vmem:[%s912_s0 + $0x20] sm:$0xff]  ;;  %v34_v8 = vld [vmem:[%s912_s0 + $0x28] sm:$0xff]  ;;  %v46_v9 = vpack.c.bf16 %v32_v6, %v31_v5 }
   0x4   :  { %600 = vmatprep.subr.bf16.mxu1 %v710_v1  ;;  %v47_v10 = vpack.c.bf16 %v34_v8, %v33_v7  ;;  %v711_v11 = vld [vmem:[%s915_s3] sm:$0xff]   ;;  %v712_v12 = vld [vmem:[%s915_s3 + $0x8] sm:$0xff]  }
   0x5   :  { %602 = vmatprep.mubr.msk.bf16.mxu1 %vm76_vm0, %v45_v4 }
   0x7   :  { %601 = vmatpush3.bf16.msra.mxu1 %v710_v1 }
   0x8   :  { %13 = vsyncpa [#allocation4], 0  ;;  %618 = vmatprep.subr.bf16.mxu1 %v711_v11  ;;  %v35_v13 = vld [vmem:[%s912_s0 + $0x30] sm:$0xff]  ;;  %v36_v14 = vld [vmem:[%s912_s0 + $0x38] sm:$0xff]  ;;  %vm738_vm1 = vmmov 0   ;;  %s740_s20 = smov [#allocation3]  }
   0x9   :  { %v37_v15 = vld [vmem:[%s912_s0 + $0x40] sm:$0xff]  ;;  %v38_v16 = vld [vmem:[%s912_s0 + $0x48] sm:$0xff]  ;;  %v48_v17 = vpack.c.bf16 %v36_v14, %v35_v13  ;;  %v39_v19 = vld [vmem:[%s912_s0 + $0x50] sm:$0xff]  ;;  %s514_s21 = sshll.u32 %s740_s20, 4  ;;  %s515_s21 = int_to_ptr.vmem [resolvable:$true] %s514_s21 }
   0xa   :  { %603 = vmatmul.mubr.msk.bf16.vlgmr.msra.gmra.mrb[0].mxu1 %vm76_vm0, %v46_v9  ;;  %v49_v18 = vpack.c.bf16 %v38_v16, %v37_v15  ;;  %v40_v20 = vld [vmem:[%s912_s0 + $0x58] sm:$0xff]  ;;  %v41_v21 = vld [vmem:[%s912_s0 + $0x60] sm:$0xff]  ;;  %v42_v22 = vld [vmem:[%s912_s0 + $0x68] sm:$0xff]  ;;  %s713_s22 = scalar_lea.vmem %s515_s21, 16  ;;  %s717_s23 = scalar_lea.vmem %s515_s21, 32 }
   0xb   :  { %606 = vmatprep.mubr.msk.bf16.mxu1 %vm76_vm0, %v47_v10  ;;  %619 = vmatpush3.bf16.msra.mxu1 %v711_v11  ;;  %v50_v23 = vpack.c.bf16 %v40_v20, %v39_v19  ;;  %v51_v24 = vpack.c.bf16 %v42_v22, %v41_v21  ;;  %v43_v25 = vld [vmem:[%s912_s0 + $0x70] sm:$0xff]  ;;  %v44_v26 = vld [vmem:[%s912_s0 + $0x78] sm:$0xff]  ;;  %v522_v28 = vld [vmem:[%s914_s2] ss:$0 sm:$0xff]  ;;  %v737_v21 = vmov 0.0|0.0   ;;  %v739_v22 = vmov 0.0   ;;  %p714_p0 = scmp.ne.s32.totalorder %s515_s21, %s713_s22  ;;  %p718_p1 = scmp.lt.s32.totalorder %s515_s21, %s515_s21 }
   0xc   :  { %620 = vmatprep.subr.bf16.mxu1 %v712_v12  ;;  %v52_v27 = vpack.c.bf16 %v44_v26, %v43_v25  ;;  %673 = vmatprep.subr.bf16.mxu0 %v737_v21  ;;  %vm866_vm2 = vmpackc.low %vm76_vm0, %vm76_vm0  ;;  %p719_p2 = scmp.lt.s32.totalorder %s717_s23, %s713_s22 }
   0xd   :  { %670 = vmatprep.mubr.msk.f32.mxu0 %vm738_vm1, %v739_v22 }
   0xe   :  { %p720_p3 = por %p719_p2, %p718_p1 }
   0xf   :  { %621 = vmatpush3.bf16.msra.mxu1 %v712_v12 }
  0x10   :  { %p721_p4 = pnand %p720_p3, %p714_p0 }
  0x12   :  { %607 = vmatmul.mubr.msk.bf16.gmra.mrb[4].mxu1 %vm76_vm0, %v48_v17 }
  0x13   :  { %610 = vmatprep.mubr.msk.bf16.mxu1 %vm76_vm0, %v49_v18 }
  0x1a   :  { %611 = vmatmul.mubr.msk.bf16.gmra.mrb[8].mxu1 %vm76_vm0, %v50_v23  ;;  %v533_v23 = vld [vmem:[%s916_s4] ss:$0 sm:$0xff] }
  0x1b   :  { %614 = vmatprep.mubr.msk.bf16.mxu1 %vm76_vm0, %v51_v24 }
  0x22   :  { %615 = vmatmul.mubr.msk.bf16.gmra.mrb[12].mxu1 %vm76_vm0, %v52_v27 }
  0xdd   :  { %v604_v29 = vpop.f32.mrb[0].mxu1 }
  0xde   :  { %v144_v30 = vadd.f32 %v604_v29, %v522_v28  ;;  %v135_v31 = vpop.f32.mrb[1].mxu1 }
  0xdf   :  { %v136_v32 = vadd.f32 %v522_v28, %v135_v31  ;;  %v605_v33 = vpop.f32.mrb[2].mxu1 }
  0xe0   :  { %v147_v34 = vadd.f32 %v605_v33, %v522_v28  ;;  %v138_v35 = vpop.f32.mrb[3].mxu1  ;;  %v200_v37 = vmax.f32 %v144_v30, 0.0 }
  0xe1   :  { %v139_v36 = vadd.f32 %v522_v28, %v138_v35  ;;  %v198_v39 = vmax.f32 %v136_v32, 0.0 }
  0xe2   :  { %v201_v38 = vmax.f32 %v147_v34, 0.0 }
  0xe3   :  { %v199_v40 = vmax.f32 %v139_v36, 0.0 }
  0xe4   :  { %v215_v41 = vpack.c.bf16 %v201_v38, %v200_v37 }
  0xe5   :  { %v214_v42 = vpack.c.bf16 %v199_v40, %v198_v39  ;;  %v608_v43 = vpop.f32.mrb[4].mxu1 }
  0xe6   :  { %v160_v44 = vadd.f32 %v608_v43, %v522_v28  ;;  %v151_v45 = vpop.f32.mrb[5].mxu1 }
  0xe7   :  { %v152_v46 = vadd.f32 %v522_v28, %v151_v45  ;;  %622 = vmatprep.mubr.msk.bf16.mxu1 %vm76_vm0, %v214_v42  ;;  %v609_v47 = vpop.f32.mrb[6].mxu1 }
  0xe8   :  { %v204_v48 = vmax.f32 %v160_v44, 0.0  ;;  %v163_v49 = vadd.f32 %v609_v47, %v522_v28  ;;  %623 = vmatmul.mubr.msk.bf16.vlgmr.msra.gmra.mrb[16].mxu1 %vm76_vm0, %v215_v41  ;;  %v154_v50 = vpop.f32.mrb[7].mxu1 }
  0xe9   :  { %v202_v51 = vmax.f32 %v152_v46, 0.0  ;;  %v155_v52 = vadd.f32 %v522_v28, %v154_v50 }
  0xea   :  { %v205_v53 = vmax.f32 %v163_v49, 0.0 }
  0xeb   :  { %v203_v54 = vmax.f32 %v155_v52, 0.0 }
  0xec   :  { %v217_v55 = vpack.c.bf16 %v205_v53, %v204_v48 }
  0xed   :  { %v216_v56 = vpack.c.bf16 %v203_v54, %v202_v51  ;;  %v612_v57 = vpop.f32.mrb[8].mxu1 }
  0xee   :  { %v176_v58 = vadd.f32 %v612_v57, %v522_v28  ;;  %v167_v59 = vpop.f32.mrb[9].mxu1 }
  0xef   :  { %626 = vmatprep.mubr.msk.bf16.mxu1 %vm76_vm0, %v216_v56  ;;  %v168_v60 = vadd.f32 %v522_v28, %v167_v59  ;;  %v613_v61 = vpop.f32.mrb[10].mxu1 }
  0xf0   :  { %627 = vmatmul.mubr.msk.bf16.gmra.mrb[20].mxu1 %vm76_vm0, %v217_v55  ;;  %v208_v62 = vmax.f32 %v176_v58, 0.0  ;;  %v179_v63 = vadd.f32 %v613_v61, %v522_v28  ;;  %v170_v0 = vpop.f32.mrb[11].mxu1 }
  0xf1   :  { %v206_v1 = vmax.f32 %v168_v60, 0.0  ;;  %v171_v2 = vadd.f32 %v522_v28, %v170_v0 }
  0xf2   :  { %v209_v3 = vmax.f32 %v179_v63, 0.0 }
  0xf3   :  { %v207_v4 = vmax.f32 %v171_v2, 0.0 }
  0xf4   :  { %v219_v5 = vpack.c.bf16 %v209_v3, %v208_v62 }
  0xf5   :  { %v218_v6 = vpack.c.bf16 %v207_v4, %v206_v1  ;;  %v616_v7 = vpop.f32.mrb[12].mxu1 }
  0xf6   :  { %v192_v8 = vadd.f32 %v616_v7, %v522_v28  ;;  %v183_v9 = vpop.f32.mrb[13].mxu1 }
  0xf7   :  { %630 = vmatprep.mubr.msk.bf16.mxu1 %vm76_vm0, %v218_v6  ;;  %v184_v10 = vadd.f32 %v522_v28, %v183_v9  ;;  %v617_v11 = vpop.f32.mrb[14].mxu1 }
  0xf8   :  { %631 = vmatmul.mubr.msk.bf16.gmra.mrb[24].mxu1 %vm76_vm0, %v219_v5  ;;  %v212_v12 = vmax.f32 %v192_v8, 0.0  ;;  %v195_v13 = vadd.f32 %v617_v11, %v522_v28  ;;  %v186_v14 = vpop.f32.mrb[15].mxu1 }
  0xf9   :  { %v210_v15 = vmax.f32 %v184_v10, 0.0  ;;  %v187_v16 = vadd.f32 %v522_v28, %v186_v14 }
  0xfa   :  { %v213_v17 = vmax.f32 %v195_v13, 0.0 }
  0xfb   :  { %v211_v18 = vmax.f32 %v187_v16, 0.0 }
  0xfc   :  { %v221_v19 = vpack.c.bf16 %v213_v17, %v212_v12  ;;  %v382_v17 = vld [vmem:[%s917_s5] sm:$0x1] }
  0xfd   :  { %v220_v20 = vpack.c.bf16 %v211_v18, %v210_v15  ;;  %v384_v18 = vstv %s918_s6 }
  0xff   :  { %634 = vmatprep.mubr.msk.bf16.mxu1 %vm76_vm0, %v220_v20 }
 0x100   :  { %635 = vmatmul.mubr.msk.bf16.gmra.mrb[28].mxu1 %vm76_vm0, %v221_v19 }
 0x1bb   :  { %v624_v24 = vpop.f32.mrb[16].mxu1 }
 0x1bc   :  { %v312_v25 = vadd.f32 %v624_v24, %v533_v23  ;;  %v303_v26 = vpop.f32.mrb[17].mxu1 }
 0x1bd   :  { %v304_v27 = vadd.f32 %v533_v23, %v303_v26  ;;  %v625_v28 = vpop.f32.mrb[18].mxu1 }
 0x1be   :  { %v315_v29 = vadd.f32 %v625_v28, %v533_v23  ;;  %v306_v30 = vpop.f32.mrb[19].mxu1  ;;  %v368_v32 = vmax.f32 %v312_v25, 0.0 }
 0x1bf   :  { %v307_v31 = vadd.f32 %v533_v23, %v306_v30  ;;  %v366_v34 = vmax.f32 %v304_v27, 0.0 }
 0x1c0   :  { %v369_v33 = vmax.f32 %v315_v29, 0.0 }
 0x1c1   :  { %v367_v35 = vmax.f32 %v307_v31, 0.0 }
 0x1c2   :  { %v678_v36 = vpack.c.bf16 %v369_v33, %v368_v32 }
 0x1c3   :  { %v674_v38 = vpack.c.bf16 %v367_v35, %v366_v34  ;;  %v628_v39 = vpop.f32.mrb[20].mxu1 }
 0x1c4   :  { %v328_v40 = vadd.f32 %v628_v39, %v533_v23  ;;  %v319_v41 = vpop.f32.mrb[21].mxu1 }
 0x1c5   :  { %v320_v42 = vadd.f32 %v533_v23, %v319_v41  ;;  %676 = vmatpush3.bf16.xpose.msk.msra.mxu0 %vm866_vm2, %v674_v38  ;;  %v629_v43 = vpop.f32.mrb[22].mxu1 }
 0x1c6   :  { %v372_v44 = vmax.f32 %v328_v40, 0.0  ;;  %v331_v45 = vadd.f32 %v629_v43, %v533_v23  ;;  %v322_v46 = vpop.f32.mrb[23].mxu1  ;;  %677 = vmatprep.subr.bf16.mxu0 %v737_v21 }
 0x1c7   :  { %v370_v47 = vmax.f32 %v320_v42, 0.0  ;;  %v323_v48 = vadd.f32 %v533_v23, %v322_v46 }
 0x1c8   :  { %v373_v49 = vmax.f32 %v331_v45, 0.0 }
 0x1c9   :  { %v371_v50 = vmax.f32 %v323_v48, 0.0 }
 0x1ca   :  { %v686_v51 = vpack.c.bf16 %v373_v49, %v372_v44 }
 0x1cb   :  { %v682_v52 = vpack.c.bf16 %v371_v50, %v370_v47  ;;  %v632_v53 = vpop.f32.mrb[24].mxu1 }
 0x1cc   :  { %v344_v54 = vadd.f32 %v632_v53, %v533_v23  ;;  %v335_v55 = vpop.f32.mrb[25].mxu1 }
 0x1cd   :  { %680 = vmatpush3.bf16.xpose.msk.msra.mxu0 %vm866_vm2, %v678_v36  ;;  %v336_v56 = vadd.f32 %v533_v23, %v335_v55  ;;  %v633_v57 = vpop.f32.mrb[26].mxu1 }
 0x1ce   :  { %v376_v58 = vmax.f32 %v344_v54, 0.0  ;;  %681 = vmatprep.subr.bf16.mxu0 %v737_v21  ;;  %v347_v59 = vadd.f32 %v633_v57, %v533_v23  ;;  %v338_v60 = vpop.f32.mrb[27].mxu1 }
 0x1cf   :  { %v374_v61 = vmax.f32 %v336_v56, 0.0  ;;  %v339_v62 = vadd.f32 %v533_v23, %v338_v60 }
 0x1d0   :  { %v377_v63 = vmax.f32 %v347_v59, 0.0 }
 0x1d1   :  { %v375_v0 = vmax.f32 %v339_v62, 0.0 }
 0x1d2   :  { %v694_v1 = vpack.c.bf16 %v377_v63, %v376_v58 }
 0x1d3   :  { %v690_v2 = vpack.c.bf16 %v375_v0, %v374_v61  ;;  %v636_v3 = vpop.f32.mrb[28].mxu1 }
 0x1d4   :  { %v360_v4 = vadd.f32 %v636_v3, %v533_v23  ;;  %v351_v5 = vpop.f32.mrb[29].mxu1 }
 0x1d5   :  { %684 = vmatpush3.bf16.xpose.msk.msra.mxu0 %vm866_vm2, %v682_v52  ;;  %v352_v6 = vadd.f32 %v533_v23, %v351_v5  ;;  %v637_v7 = vpop.f32.mrb[30].mxu1 }
 0x1d6   :  { %685 = vmatprep.subr.bf16.mxu0 %v737_v21  ;;  %v380_v8 = vmax.f32 %v360_v4, 0.0  ;;  %v363_v9 = vadd.f32 %v637_v7, %v533_v23  ;;  %v354_v10 = vpop.f32.mrb[31].mxu1 }
 0x1d7   :  { %v378_v11 = vmax.f32 %v352_v6, 0.0  ;;  %v355_v12 = vadd.f32 %v533_v23, %v354_v10 }
 0x1d8   :  { %v381_v13 = vmax.f32 %v363_v9, 0.0 }
 0x1d9   :  { %v379_v14 = vmax.f32 %v355_v12, 0.0 }
 0x1da   :  { %v702_v15 = vpack.c.bf16 %v381_v13, %v380_v8 }
 0x1db   :  { %v698_v16 = vpack.c.bf16 %v379_v14, %v378_v11 }
 0x1dd   :  { %688 = vmatpush3.bf16.xpose.msk.msra.mxu0 %vm866_vm2, %v686_v51 }
 0x1de   :  { %689 = vmatprep.subr.bf16.mxu0 %v737_v21 }
 0x1e5   :  { %692 = vmatpush3.bf16.xpose.msk.msra.mxu0 %vm866_vm2, %v690_v2 }
 0x1e6   :  { %693 = vmatprep.subr.bf16.mxu0 %v737_v21 }
 0x1ed   :  { %696 = vmatpush3.bf16.xpose.msk.msra.mxu0 %vm866_vm2, %v694_v1 }
 0x1ee   :  { %697 = vmatprep.subr.bf16.mxu0 %v737_v21 }
 0x1f5   :  { %700 = vmatpush3.bf16.xpose.msk.msra.mxu0 %vm866_vm2, %v698_v16 }
 0x1f6   :  { %701 = vmatprep.subr.bf16.mxu0 %v737_v21 }
 0x1fd   :  { %704 = vmatpush3.bf16.xpose.msk.msra.mxu0 %vm866_vm2, %v702_v15 }
 0x204   :  { %671 = vmatmul.mubr.msk.f32.vlgmr.msra.gmra.mrb[0].mxu0 %vm76_vm0, %v382_v17 }
 0x2d7   :  { %v502_v19 = vpop.f32.mrb[0].mxu0 }
 0x2d8   :  { %v503_v20 = vadd.f32 %v502_v19, %v384_v18  ;;  %v672_v22 = vpop.f32.mrb[1].mxu0 }
 0x2da   :  { %v506_v23 = vmax.f32 %v503_v20, 0.0 }
 0x2dc   :  { %507 = vst [vmem:[#allocation3] sm:$0x1] %v506_v23 }
 0x2dd   :  { %724 = shalt.err (!%p721_p4)
}
 0x2de   :  { %s725_s6 = scalar_lea.hbm %s919_s7, 16 }
 0x2df   :  { %p726_p5 = scmp.ne.s32.totalorder %s919_s7, %s725_s6  ;;  %p729_p6 = scmp.lt.u32.totalorder %s725_s6, %s919_s7 }
 0x2e1   :  { %p731_p7 = pnand %p729_p6, %p726_p5 }
 0x2e3   :  { %734 = shalt.err (!%p731_p7)
}
 0x2e4   :  { %517 = dma.vmem_to_hbm [thread:$0]  %s515_s21, 16, %s919_s7, [#allocation4]  }
 0x2e5   :  { %735 = dma.done.wait [#allocation4], 16  }
 0x2e6   :  { %736 = vsyncadd [#allocation4], 4294967280 }
 0x2e7   :  { %521 = vsyncpa [#allocation4], 1 }

</bundles_post_ra>
